<compile_context>
chip_gen: v5e
topology: v5e:2x2
jax: 0.10.0
libtpu: 0.0.40
codegen_flags: <defaults>
</compile_context>

<pallas_src>
import jax
import jax.numpy as jnp
from jax.experimental import pallas as pl
from jax.experimental.pallas import tpu as pltpu


def _softened_threshgate_kernel(acts_ref, gate_ref, out_ref):
    acts = acts_ref[...]
    gate = gate_ref[...]
    # relu/mul on the VPU; sigmoid's exp/recip go to the EUP (separate bundle slot).
    # Native-dtype compute: v6e/v7x have bf16 VPU/EUP paths; on v5e Mosaic inserts the
    # needed upconversion, fully hidden under the DMA-bound steps.
    out_ref[...] = jnp.maximum(acts, 0.0) * jax.nn.sigmoid(gate)


def _round_up(x: int, m: int) -> int:
    return (x + m - 1) // m * m


# Native sublane tile height by itemsize: (8,128) f32, (16,128) bf16, (32,128) int8/fp8.
_SUBLANE = {4: 8, 2: 16, 1: 32}

# Lane widths tried in order: largest multiple of 128 that divides n -> zero-copy reshape.
_LANE_CANDIDATES = (4096, 2048, 1024, 512, 256, 128)


def _vmem_budget_bytes() -> int:
    """Generation-aware scoped-VMEM budget (v7x: 64 MiB/TC, v5e/v6e: 128 MiB)."""
    try:
        cap = int(pltpu.get_tpu_info().vmem_capacity_bytes)
    except Exception:
        cap = 64 << 20  # conservative fallback = v7x per-TensorCore capacity
    return min(48 << 20, max(16 << 20, cap // 2))


def softened_threshgate(acts: jax.Array, gate_acts: jax.Array) -> jax.Array:
    assert acts.shape == gate_acts.shape, "acts and gate_acts must match"
    assert acts.dtype == gate_acts.dtype, "acts and gate_acts must share a dtype"

    orig_shape = acts.shape
    dtype = acts.dtype
    itemsize = jnp.dtype(dtype).itemsize
    sub = _SUBLANE.get(itemsize, 8)

    n = acts.size
    if n == 0:
        return jnp.zeros(orig_shape, dtype)

    vmem_limit = _vmem_budget_bytes()
    # 3 streams (2 in + 1 out), double-buffered, ~2x headroom for compiler scratch.
    target_tile_bytes = max(512 * 1024, vmem_limit // 12)

    # Pick the lane width. If some multiple-of-128 width divides n exactly, the reshape to
    # (rows, tn) is free (metadata only) and there is no pad and no output slice.
    tn = None
    for cand in _LANE_CANDIDATES:
        if n % cand == 0:
            tn = cand
            break
    needs_pad = tn is None  # truly ragged: pad only the tail (<= 127 elements)
    if needs_pad:
        tn = 128

    n_pad = _round_up(n, tn)
    rows = n_pad // tn

    # Biggest dtype-aligned (sublane-multiple) tile under the per-stream byte budget.
    max_rows = max(sub, (target_tile_bytes // (tn * itemsize)) // sub * sub)
    if rows <= sub:
        # Full-dim block (exempt from the (8,128) rule); single grid step.
        block_rows = rows
    else:
        # Clamp so the grid has >= 2 steps: both v7x TensorCores get work.
        block_rows = min(max_rows, _round_up(pl.cdiv(rows, 2), sub))

    grid = (pl.cdiv(rows, block_rows),)  # partial last block is masked by Pallas
    spec = pl.BlockSpec((block_rows, tn), lambda i: (i, 0))

    def _prep(x):
        flat = x.reshape(-1)  # free reshape
        if needs_pad:
            # relu(0) * sigmoid(0) == 0, so the zero tail is harmless and sliced off below.
            flat = jnp.pad(flat, (0, n_pad - n))
        return flat.reshape(rows, tn)

    a2 = _prep(acts)
    g2 = _prep(gate_acts)

    out2 = pl.pallas_call(
        _softened_threshgate_kernel,
        out_shape=jax.ShapeDtypeStruct((rows, tn), dtype),
        grid_spec=pltpu.PrefetchScalarGridSpec(
            num_scalar_prefetch=0,
            grid=grid,
            in_specs=[spec, spec],
            out_specs=spec,
        ),
        compiler_params=pltpu.CompilerParams(
            dimension_semantics=("parallel",),
            vmem_limit_bytes=vmem_limit,
        ),
        cost_estimate=pl.CostEstimate(
            flops=2 * n,
            transcendentals=n,
            bytes_accessed=3 * n * itemsize,
        ),
    )(a2, g2)

    if needs_pad:
        return out2.reshape(-1)[:n].reshape(orig_shape)
    return out2.reshape(orig_shape)


if __name__ == "__main__":
    key = jax.random.PRNGKey(0)
    k1, k2, k3, k4 = jax.random.split(key, 4)

    # Small [batch, hidden] shape consistent with the module's elementwise forward.
    B, H = 4, 256
    acts = jax.random.normal(k1, (B, H), dtype=jnp.float32)
    gate_acts = jax.random.normal(k2, (B, H), dtype=jnp.float32)

    out = softened_threshgate(acts, gate_acts)
    jax.block_until_ready(out)
    ref = jnp.maximum(acts, 0.0) * jax.nn.sigmoid(gate_acts)
    assert out.shape == ref.shape
    assert jnp.allclose(out, ref, atol=1e-6, rtol=1e-6), "mismatch vs reference"

    # Ragged shape exercises the tail-pad / output-slice path (n % 128 != 0).
    B2, H2 = 7, 300
    acts2 = jax.random.normal(k3, (B2, H2), dtype=jnp.float32)
    gate2 = jax.random.normal(k4, (B2, H2), dtype=jnp.float32)
    out2 = softened_threshgate(acts2, gate2)
    jax.block_until_ready(out2)
    ref2 = jnp.maximum(acts2, 0.0) * jax.nn.sigmoid(gate2)
    assert out2.shape == ref2.shape
    assert jnp.allclose(out2, ref2, atol=1e-6, rtol=1e-6), "mismatch vs reference (ragged)"

    print("KERNEL_OK")
</pallas_src>

<mosaic_0001>
module attributes {stable_mosaic.version = 11 : i64} {
  func.func @_softened_threshgate_kernel(%arg0: i32, %arg1: memref<1x1024xf32, #tpu.memory_space<vmem>>, %arg2: memref<1x1024xf32, #tpu.memory_space<vmem>>, %arg3: memref<1x1024xf32, #tpu.memory_space<vmem>>) attributes {dimension_semantics = [#tpu.dimension_semantics<parallel>], iteration_bounds = array<i64: 1>, scalar_prefetch = 0 : i64, scratch_operands = 0 : i64, tpu.core_type = #tpu.core_type<tc>, window_params = [{transform_indices = @transform_0, window_bounds = array<i64: 1, 1024>}, {transform_indices = @transform_1, window_bounds = array<i64: 1, 1024>}, {transform_indices = @transform_2, window_bounds = array<i64: 1, 1024>}]} {
    %c0 = arith.constant 0 : index
    %c0_0 = arith.constant 0 : index
    %0 = vector.load %arg1[%c0, %c0_0] : memref<1x1024xf32, #tpu.memory_space<vmem>>, vector<1x1024xf32>
    %c0_1 = arith.constant 0 : index
    %c0_2 = arith.constant 0 : index
    %1 = vector.load %arg2[%c0_1, %c0_2] : memref<1x1024xf32, #tpu.memory_space<vmem>>, vector<1x1024xf32>
    %cst = arith.constant 0.000000e+00 : f32
    %2 = vector.broadcast %cst : f32 to vector<1x1024xf32>
    %3 = arith.maximumf %0, %2 : vector<1x1024xf32>
    %4 = arith.negf %1 : vector<1x1024xf32>
    %5 = math.exp %4 : vector<1x1024xf32>
    %cst_3 = arith.constant 1.000000e+00 : f32
    %6 = vector.broadcast %cst_3 : f32 to vector<1x1024xf32>
    %7 = arith.addf %6, %5 : vector<1x1024xf32>
    %8 = arith.divf %6, %7 : vector<1x1024xf32>
    %9 = arith.mulf %3, %8 : vector<1x1024xf32>
    %c0_4 = arith.constant 0 : index
    %c0_5 = arith.constant 0 : index
    %10 = vector.load %arg3[%c0_4, %c0_5] : memref<1x1024xf32, #tpu.memory_space<vmem>>, vector<1x1024xf32>
    tpu.vector_store %arg3[%c0_4, %c0_5], %9 {strides = array<i32>} : memref<1x1024xf32, #tpu.memory_space<vmem>>, vector<1x1024xf32>,
    return
  }
  func.func @transform_0(%arg0: i32) -> (i32, i32) {
    %c0_i32 = arith.constant 0 : i32
    %c0_i32_0 = arith.constant 0 : i32
    return %arg0, %c0_i32 : i32, i32
  }
  func.func @transform_1(%arg0: i32) -> (i32, i32) {
    %c0_i32 = arith.constant 0 : i32
    %c0_i32_0 = arith.constant 0 : i32
    return %arg0, %c0_i32 : i32, i32
  }
  func.func @transform_2(%arg0: i32) -> (i32, i32) {
    %c0_i32 = arith.constant 0 : i32
    %c0_i32_0 = arith.constant 0 : i32
    return %arg0, %c0_i32 : i32, i32
  }
}

</mosaic_0001>

<bundles_post_ra>
// kernel: tpu_custom_call.1
= control target key start
LH: loop header
LB: loop body
LE: loop exit
PB: predicated region body
PF: predicated region fallthrough
CT: control target
= control target key end

     0   :  { %7 = vsyncpa [#allocation3], 0  ;;  %s195_s0 = inlined_call_operand.hbm [shape: f32[1,1024], index: 0, kind: input, shape index: {}]   ;;  %s196_s1 = inlined_call_operand.hbm [shape: f32[1,1024], index: 1, kind: input, shape index: {}]   ;;  %s197_s2 = inlined_call_operand.hbm [shape: f32[1,1024], index: 2, kind: output, shape index: {}]  }
   0x1   :  { %8 = vsyncpa [#allocation6], 0 }
   0x2   :  { %9 = vsyncpa [#allocation4], 0  ;;  %s15_s11 = sshll.u32 %s195_s0, 4  ;;  %s168_s12 = smov [#allocation2]   ;;  %s16_s11 = int_to_ptr.hbm [resolvable:$true] %s15_s11 }
   0x3   :  { %s17_s13 = sshll.u32 %s168_s12, 4  ;;  %s26_s16 = sshll.u32 %s196_s1, 4  ;;  %s18_s13 = int_to_ptr.vmem [resolvable:$true] %s17_s13  ;;  %s27_s16 = int_to_ptr.hbm [resolvable:$true] %s26_s16 }
   0x4   :  { %20 = dma.hbm_to_vmem [thread:$0]  %s16_s11, 128, %s18_s13, [#allocation3]  }
   0x5   :  { %s169_s17 = smov [#allocation5]  }
   0x6   :  { %s28_s18 = sshll.u32 %s169_s17, 4  ;;  %s29_s18 = int_to_ptr.vmem [resolvable:$true] %s28_s18 }
   0x7   :  { %31 = dma.hbm_to_vmem [thread:$0]  %s27_s16, 128, %s29_s18, [#allocation6]  }
   0x8   :  { %162 = dma.done.wait [#allocation3], 128  }
   0x9   :  { %163 = vsyncadd [#allocation3], 4294967168 }
   0xa   :  { %164 = dma.done.wait [#allocation6], 128  }
   0xb   :  { %165 = vsyncadd [#allocation6], 4294967168  ;;  %v41_v0 = vld [vmem:[#allocation5] sm:$0xff]  ;;  %v40_v9 = vld [vmem:[#allocation2] sm:$0xff]  ;;  %s170_s0 = smov [#allocation7]   ;;  %s71_s21 = sshll.u32 %s197_s2, 4  ;;  %s72_s21 = int_to_ptr.hbm [resolvable:$true] %s71_s21 }
   0xc   :  { %v82_v1 = vmul.f32 -1.442695, %v41_v0  ;;  %v42_v12 = vmax.f32 %v40_v9, 0.0  ;;  %s69_s1 = sshll.u32 %s170_s0, 4  ;;  %s70_s1 = int_to_ptr.vmem [resolvable:$true] %s69_s1 }
   0xe   :  { %86 = vpow2.f32 %v82_v1 }
  0x14   :  { %v87_v2 = vpop.eup %86 }
  0x15   :  { %v46_v3 = vadd.f32 1.0, %v87_v2 }
  0x17   :  { %88 = vrcp.f32 %v46_v3  ;;  %v58_v6 = vand.u32 2147483648, %v46_v3  ;;  %vm52_vm0 = vweird.f32 %v46_v3  ;;  %v56_v8 = vand.u32 2147483647, %v46_v3 }
  0x19   :  { %v59_v11 = vor.u32 1.1754944e-38, %v58_v6  ;;  %vm57_vm3 = vcmp.eq.f32.partialorder %v56_v8, 8.507059e+37 }
  0x1d   :  { %v89_v4 = vpop.eup %88 }
  0x1e   :  { %v48_v5 = vmul.f32 %v89_v4, %v46_v3  ;;  %vm53_vm1 = vweird.f32 %v89_v4 }
  0x1f   :  { %vm54_vm2 = vmor %vm52_vm0, %vm53_vm1 }
  0x20   :  { %v49_v7 = vsub.f32 1.0, %v48_v5 }
  0x22   :  { %v50_v10 = vmul.f32 %v89_v4, %v49_v7 }
  0x24   :  { %v51_v13 = vadd.f32 %v89_v4, %v50_v10 }
  0x26   :  { %v55_v14 = vsel %vm54_vm2, %v89_v4, %v51_v13 }
  0x27   :  { %v60_v15 = vsel %vm57_vm3, %v59_v11, %v55_v14 }
  0x28   :  { %v62_v16 = vmul.f32 %v60_v15, %v42_v12 }
  0x2a   :  { %63 = vst [vmem:[#allocation7] sm:$0xff] %v62_v16 }
  0x2b   :  { %74 = dma.vmem_to_hbm [thread:$0]  %s70_s1, 128, %s72_s21, [#allocation4]  }
  0x2c   :  { %166 = dma.done.wait [#allocation4], 128  }
  0x2d   :  { %167 = vsyncadd [#allocation4], 4294967168 }
  0x2e   :  { %79 = vsyncpa [#allocation3], 1 }
  0x2f   :  { %80 = vsyncpa [#allocation6], 1 }
  0x30   :  { %81 = vsyncpa [#allocation4], 1 }

</bundles_post_ra>
